<compile_context>
chip_gen: v6e
topology: v6e:2x2x1
jax: 0.10.0
libtpu: 0.0.40
codegen_flags: <defaults>
</compile_context>

<pallas_src>
import math
import jax
import jax.numpy as jnp
from jax.experimental import pallas as pl
from jax.experimental.pallas import tpu as pltpu

# ---------------- config (small, consistent with the module) ----------------
BATCH = 2
SEQ = 8
HIDDEN = 32
NUM_HEADS = 4
NUM_KV_HEADS = 2
HEAD_DIM = HIDDEN // NUM_HEADS          # 8
D_ROT = HEAD_DIM // 2                   # 4 (rotary applied to the first half)
REP = NUM_HEADS // NUM_KV_HEADS         # 2 (GQA share factor)

NEG_INF = -1e30   # f32 additive mask; make dtype-aware if operands move to bf16


def attention_forward(x, cos, sin, wq, wk, wv, wo):
    """x: (B, S, H); cos/sin: (S, D_ROT); weights in nn.Linear [out, in] layout."""
    B, S, H = x.shape
    NH, NKV, HD, rep = NUM_HEADS, NUM_KV_HEADS, HEAD_DIM, REP
    d_rot = cos.shape[-1]
    half = d_rot // 2
    BS = B * S
    sm_scale = 1.0 / math.sqrt(HD)

    QW, KW, VW = NH * HD, NKV * HD, NKV * HD     # 32, 16, 16
    MAIN_W = QW + KW + VW                        # 64
    # total projection width = 2 * MAIN_W = 128 -> lane-dense matmul output

    # ------------- host-side layout plumbing (weight-load-time cost) --------
    x2d = x.reshape(BS, H)

    # Projection columns pre-transposed to [in, out]; softmax scale folded into
    # the Q columns so the kernel never multiplies by sm_scale.
    q_cols = wq.T * sm_scale                     # (H, QW), head-major
    k_cols = wk.T                                # (H, KW), kv-head-major
    v_cols = wv.T                                # (H, VW)

    def rotate_half_cols(cols, n_heads):
        # Columns producing rotate_half(x @ cols) on the first d_rot lanes of
        # each head:  per head [c0..c_{HD-1}] -> [-c_half..-c_{d_rot-1}, c_0..c_{half-1}, 0..]
        c = cols.reshape(H, n_heads, HD)
        rc = jnp.concatenate(
            [-c[..., half:d_rot], c[..., :half],
             jnp.zeros((H, n_heads, HD - d_rot), cols.dtype)], axis=-1)
        return rc.reshape(H, n_heads * HD)

    w_big = jnp.concatenate(
        [q_cols, k_cols, v_cols,                        # "main" slab (64 cols)
         rotate_half_cols(q_cols, NH),                  # "rot" slab  (64 cols,
         rotate_half_cols(k_cols, NKV),                 #  zero-padded over V)
         jnp.zeros((H, VW), x.dtype)], axis=-1)         # (H, 128)

    # RoPE tables at main-slab width; pass-through lanes and V columns get
    # cos=1 / sin=0, so V rides through the elementwise RoPE unchanged.
    cos_head = jnp.concatenate([cos, jnp.ones((S, HD - d_rot), cos.dtype)], -1)
    sin_head = jnp.concatenate([sin, jnp.zeros((S, HD - d_rot), sin.dtype)], -1)
    cos_tab = jnp.tile(jnp.concatenate(
        [jnp.tile(cos_head, (1, NH)), jnp.tile(cos_head, (1, NKV)),
         jnp.ones((S, VW), cos.dtype)], axis=-1), (B, 1))         # (BS, 64)
    sin_tab = jnp.tile(jnp.concatenate(
        [jnp.tile(sin_head, (1, NH)), jnp.tile(sin_head, (1, NKV)),
         jnp.zeros((S, VW), sin.dtype)], axis=-1), (B, 1))        # (BS, 64)

    # Additive mask bias: query rows are r*BS + (b*S+s) (r = head-in-group),
    # key cols are b'*S+s'; allowed iff same batch and causal.  Shared by both
    # kv groups, broadcast over g in-kernel.
    qi = jnp.arange(rep * BS) % BS
    kj = jnp.arange(BS)
    allowed = ((qi[:, None] // S) == (kj[None, :] // S)) & \
              ((kj[None, :] % S) <= (qi[:, None] % S))
    bias = jnp.where(allowed, 0.0, NEG_INF).astype(jnp.float32)   # (rep*BS, BS)

    wo_t = wo.T                                                   # (NH*HD, H)

    # ------------------------------- kernel ---------------------------------
    def kernel(x_ref, cos_ref, sin_ref, bias_ref, wqkv_ref, wo_ref, o_ref):
        # 1 MXU push: fused Q/K/V (+rotate_half(Q/K)) projection, lane-dense N=128.
        qkv = jnp.dot(x_ref[...], wqkv_ref[...],
                      preferred_element_type=jnp.float32)         # (BS, 128)
        main = qkv[:, :MAIN_W]                                    # (BS, 64)
        rot = qkv[:, MAIN_W:]                                     # (BS, 64)

        # RoPE (+ V pass-through) as pure VPU work.
        roped = main * cos_ref[...] + rot * sin_ref[...]          # (BS, 64)

        # GQA grouping: stack the rep query heads of each kv group along the
        # row axis so each K/V head is projected, RoPE'd and used exactly once.
        q_g = jnp.stack([
            jnp.concatenate(
                [roped[:, (g * rep + r) * HD:(g * rep + r + 1) * HD]
                 for r in range(rep)], axis=0)
            for g in range(NKV)], axis=0)                         # (NKV, rep*BS, HD)
        k_g = jnp.stack([roped[:, QW + g * HD:QW + (g + 1) * HD]
                         for g in range(NKV)], axis=0)            # (NKV, BS, HD)
        v_g = jnp.stack([roped[:, QW + KW + g * HD:QW + KW + (g + 1) * HD]
                         for g in range(NKV)], axis=0)            # (NKV, BS, HD)

        scores = jnp.einsum('gqd,gkd->gqk', q_g, k_g,
                            preferred_element_type=jnp.float32)   # (NKV, rep*BS, BS)
        scores = scores + bias_ref[...][None]

        m = jnp.max(scores, axis=-1, keepdims=True)
        p = jnp.exp(scores - m)
        p = p / jnp.sum(p, axis=-1, keepdims=True)                # exact divide

        ctx = jnp.einsum('gqk,gkd->gqd', p, v_g,
                         preferred_element_type=jnp.float32)      # (NKV, rep*BS, HD)

        # concat(heads) along lanes, then one 2-D output projection:
        # the head reduction is absorbed into the K=NH*HD contraction.
        ctx2d = jnp.concatenate(
            [ctx[h // rep, (h % rep) * BS:(h % rep + 1) * BS, :]
             for h in range(NH)], axis=-1)                        # (BS, NH*HD)
        o_ref[...] = jnp.dot(ctx2d, wo_ref[...],
                             preferred_element_type=jnp.float32).astype(o_ref.dtype)

    vmem = pl.BlockSpec(memory_space=pltpu.MemorySpace.VMEM)
    out2d = pl.pallas_call(
        kernel,
        out_shape=jax.ShapeDtypeStruct((BS, H), x.dtype),
        in_specs=[vmem] * 6,
        out_specs=vmem,
    )(x2d, cos_tab, sin_tab, bias, w_big, wo_t)
    return out2d.reshape(B, S, H)


# ------------------------- pure-JAX reference --------------------------------
def _ref_rope(x, cos, sin):
    d_rot = cos.shape[-1]
    x_rot = x[..., :d_rot]
    half = d_rot // 2
    x1, x2 = x_rot[..., :half], x_rot[..., half:]
    rot_half = jnp.concatenate([-x2, x1], axis=-1)
    c = cos[None, :, None, :]
    s = sin[None, :, None, :]
    x_rotated = x_rot * c + rot_half * s
    return jnp.concatenate([x_rotated, x[..., d_rot:]], axis=-1)


def reference_forward(x, cos, sin, wq, wk, wv, wo):
    B, S, H = x.shape
    with jax.default_matmul_precision("float32"):
        q = x @ wq.T
        k = x @ wk.T
        v = x @ wv.T
        q = q.reshape(B, S, NUM_HEADS, HEAD_DIM)
        k = k.reshape(B, S, NUM_KV_HEADS, HEAD_DIM)
        v = v.reshape(B, S, NUM_KV_HEADS, HEAD_DIM)
        q = _ref_rope(q, cos, sin)
        k = _ref_rope(k, cos, sin)
        q = q.transpose(0, 2, 1, 3)                               # (B, NH, S, HD)
        k = k.transpose(0, 2, 1, 3)
        v = v.transpose(0, 2, 1, 3)
        k = jnp.repeat(k, REP, axis=1)
        v = jnp.repeat(v, REP, axis=1)
        scores = jnp.einsum("bhqd,bhkd->bhqk", q, k) / math.sqrt(HEAD_DIM)
        mask = jnp.triu(jnp.ones((S, S), dtype=bool), k=1)
        scores = jnp.where(mask[None, None], -jnp.inf, scores)
        p = jax.nn.softmax(scores, axis=-1)
        out = jnp.einsum("bhqk,bhkd->bhqd", p, v)
        out = out.transpose(0, 2, 1, 3).reshape(B, S, H)
        return out @ wo.T


if __name__ == "__main__":
    key = jax.random.PRNGKey(0)
    kx, kq, kk, kv, ko = jax.random.split(key, 5)

    x = jax.random.normal(kx, (BATCH, SEQ, HIDDEN), dtype=jnp.float32)

    # deterministic rotary tables (like precomputed cos/sin caches)
    pos = jnp.arange(SEQ, dtype=jnp.float32)[:, None]                  # (S, 1)
    inv_freq = 1.0 / (10000.0 ** (jnp.arange(D_ROT, dtype=jnp.float32) / D_ROT))
    angles = pos * inv_freq[None, :]                                   # (S, D_ROT)
    cos = jnp.cos(angles)
    sin = jnp.sin(angles)

    # deterministic weights (nn.Linear convention: [out_features, in_features])
    scale = 1.0 / math.sqrt(HIDDEN)
    wq = jax.random.normal(kq, (NUM_HEADS * HEAD_DIM, HIDDEN), jnp.float32) * scale
    wk = jax.random.normal(kk, (NUM_KV_HEADS * HEAD_DIM, HIDDEN), jnp.float32) * scale
    wv = jax.random.normal(kv, (NUM_KV_HEADS * HEAD_DIM, HIDDEN), jnp.float32) * scale
    wo = jax.random.normal(ko, (HIDDEN, HIDDEN), jnp.float32) * scale

    out = attention_forward(x, cos, sin, wq, wk, wv, wo)
    out = jax.block_until_ready(out)

    ref = reference_forward(x, cos, sin, wq, wk, wv, wo)
    assert out.shape == (BATCH, SEQ, HIDDEN)
    # Exact softmax divide restored; remaining slack only covers fp32 MXU
    # pass-emulation rounding differences between Mosaic and the XLA reference.
    assert jnp.allclose(out, ref, atol=5e-3, rtol=5e-3), "mismatch vs reference"

    print("KERNEL_OK")
</pallas_src>

<mosaic_0001>
module attributes {stable_mosaic.version = 11 : i64} {
  func.func @kernel(%arg0: memref<16x32xf32, #tpu.memory_space<vmem>>, %arg1: memref<16x64xf32, #tpu.memory_space<vmem>>, %arg2: memref<16x64xf32, #tpu.memory_space<vmem>>, %arg3: memref<32x16xf32, #tpu.memory_space<vmem>>, %arg4: memref<32x128xf32, #tpu.memory_space<vmem>>, %arg5: memref<32x32xf32, #tpu.memory_space<vmem>>, %arg6: memref<16x32xf32, #tpu.memory_space<vmem>>) attributes {dimension_semantics = [], scalar_prefetch = 0 : i64, scratch_operands = 0 : i64, tpu.core_type = #tpu.core_type<tc>} {
    %c0 = arith.constant 0 : index
    %c0_0 = arith.constant 0 : index
    %0 = vector.load %arg0[%c0, %c0_0] : memref<16x32xf32, #tpu.memory_space<vmem>>, vector<16x32xf32>
    %c0_1 = arith.constant 0 : index
    %c0_2 = arith.constant 0 : index
    %1 = vector.load %arg4[%c0_1, %c0_2] : memref<32x128xf32, #tpu.memory_space<vmem>>, vector<32x128xf32>
    %cst = arith.constant dense<0.000000e+00> : vector<16x128xf32>
    %2 = tpu.matmul %0, %1, %cst {dimension_numbers = #tpu.dot_dimension_numbers<[1], [0], [0], [1], [0, 0, 1, 1], [], []>} : vector<16x32xf32>, vector<32x128xf32>, vector<16x128xf32> -> vector<16x128xf32>
    %3 = vector.extract_strided_slice %2 {offsets = [0, 0], sizes = [16, 64], strides = [1, 1]} : vector<16x128xf32> to vector<16x64xf32>
    %4 = vector.extract_strided_slice %2 {offsets = [0, 64], sizes = [16, 64], strides = [1, 1]} : vector<16x128xf32> to vector<16x64xf32>
    %c0_3 = arith.constant 0 : index
    %c0_4 = arith.constant 0 : index
    %5 = vector.load %arg1[%c0_3, %c0_4] : memref<16x64xf32, #tpu.memory_space<vmem>>, vector<16x64xf32>
    %6 = arith.mulf %3, %5 : vector<16x64xf32>
    %c0_5 = arith.constant 0 : index
    %c0_6 = arith.constant 0 : index
    %7 = vector.load %arg2[%c0_5, %c0_6] : memref<16x64xf32, #tpu.memory_space<vmem>>, vector<16x64xf32>
    %8 = arith.mulf %4, %7 : vector<16x64xf32>
    %9 = arith.addf %6, %8 : vector<16x64xf32>
    %10 = vector.extract_strided_slice %9 {offsets = [0, 0], sizes = [16, 8], strides = [1, 1]} : vector<16x64xf32> to vector<16x8xf32>
    %11 = vector.extract_strided_slice %9 {offsets = [0, 8], sizes = [16, 8], strides = [1, 1]} : vector<16x64xf32> to vector<16x8xf32>
    %12 = tpu.concatenate %10, %11 in 0 : vector<16x8xf32>, vector<16x8xf32> -> vector<32x8xf32>
    %13 = vector.extract_strided_slice %9 {offsets = [0, 16], sizes = [16, 8], strides = [1, 1]} : vector<16x64xf32> to vector<16x8xf32>
    %14 = vector.extract_strided_slice %9 {offsets = [0, 24], sizes = [16, 8], strides = [1, 1]} : vector<16x64xf32> to vector<16x8xf32>
    %15 = tpu.concatenate %13, %14 in 0 : vector<16x8xf32>, vector<16x8xf32> -> vector<32x8xf32>
    %16 = vector.shape_cast %12 : vector<32x8xf32> to vector<1x32x8xf32>
    %17 = vector.shape_cast %15 : vector<32x8xf32> to vector<1x32x8xf32>
    %18 = tpu.concatenate %16, %17 in 0 : vector<1x32x8xf32>, vector<1x32x8xf32> -> vector<2x32x8xf32>
    %19 = vector.extract_strided_slice %9 {offsets = [0, 32], sizes = [16, 8], strides = [1, 1]} : vector<16x64xf32> to vector<16x8xf32>
    %20 = vector.extract_strided_slice %9 {offsets = [0, 40], sizes = [16, 8], strides = [1, 1]} : vector<16x64xf32> to vector<16x8xf32>
    %21 = vector.shape_cast %19 : vector<16x8xf32> to vector<1x16x8xf32>
    %22 = vector.shape_cast %20 : vector<16x8xf32> to vector<1x16x8xf32>
    %23 = tpu.concatenate %21, %22 in 0 : vector<1x16x8xf32>, vector<1x16x8xf32> -> vector<2x16x8xf32>
    %24 = vector.extract_strided_slice %9 {offsets = [0, 48], sizes = [16, 8], strides = [1, 1]} : vector<16x64xf32> to vector<16x8xf32>
    %25 = vector.extract_strided_slice %9 {offsets = [0, 56], sizes = [16, 8], strides = [1, 1]} : vector<16x64xf32> to vector<16x8xf32>
    %26 = vector.shape_cast %24 : vector<16x8xf32> to vector<1x16x8xf32>
    %27 = vector.shape_cast %25 : vector<16x8xf32> to vector<1x16x8xf32>
    %28 = tpu.concatenate %26, %27 in 0 : vector<1x16x8xf32>, vector<1x16x8xf32> -> vector<2x16x8xf32>
    "tpu.trace_start"() <{level = 10 : i32, message = "gqd,gkd->gqk"}> : () -> ()
    %cst_7 = arith.constant dense<0.000000e+00> : vector<2x32x16xf32>
    %29 = tpu.matmul %18, %23, %cst_7 {dimension_numbers = #tpu.dot_dimension_numbers<[2], [2], [1], [1], [0, 0, 0, 1, 1, 1], [0], [0]>} : vector<2x32x8xf32>, vector<2x16x8xf32>, vector<2x32x16xf32> -> vector<2x32x16xf32>
    "tpu.trace_stop"() : () -> ()
    %c0_8 = arith.constant 0 : index
    %c0_9 = arith.constant 0 : index
    %30 = vector.load %arg3[%c0_8, %c0_9] : memref<32x16xf32, #tpu.memory_space<vmem>>, vector<32x16xf32>
    %31 = vector.shape_cast %30 : vector<32x16xf32> to vector<1x32x16xf32>
    %32 = vector.broadcast %31 : vector<1x32x16xf32> to vector<2x32x16xf32>
    %33 = arith.addf %29, %32 : vector<2x32x16xf32>
    %cst_10 = arith.constant dense<0xFF800000> : vector<2x32xf32>
    %34 = vector.multi_reduction <maximumf>, %33, %cst_10 [2] : vector<2x32x16xf32> to vector<2x32xf32>
    %35 = vector.shape_cast %34 : vector<2x32xf32> to vector<2x32x1xf32>
    %36 = vector.broadcast %35 : vector<2x32x1xf32> to vector<2x32x16xf32>
    %37 = arith.subf %33, %36 : vector<2x32x16xf32>
    %38 = math.exp %37 : vector<2x32x16xf32>
    %cst_11 = arith.constant dense<0.000000e+00> : vector<2x32xf32>
    %39 = vector.multi_reduction <add>, %38, %cst_11 [2] : vector<2x32x16xf32> to vector<2x32xf32>
    %40 = vector.shape_cast %39 : vector<2x32xf32> to vector<2x32x1xf32>
    %41 = vector.broadcast %40 : vector<2x32x1xf32> to vector<2x32x16xf32>
    %42 = arith.divf %38, %41 : vector<2x32x16xf32>
    "tpu.trace_start"() <{level = 10 : i32, message = "gqk,gkd->gqd"}> : () -> ()
    %cst_12 = arith.constant dense<0.000000e+00> : vector<2x32x8xf32>
    %43 = tpu.matmul %42, %28, %cst_12 {dimension_numbers = #tpu.dot_dimension_numbers<[2], [1], [1], [2], [0, 0, 0, 1, 1, 2], [0], [0]>} : vector<2x32x16xf32>, vector<2x16x8xf32>, vector<2x32x8xf32> -> vector<2x32x8xf32>
    "tpu.trace_stop"() : () -> ()
    %44 = vector.extract_strided_slice %43 {offsets = [0, 0, 0], sizes = [1, 16, 8], strides = [1, 1, 1]} : vector<2x32x8xf32> to vector<1x16x8xf32>
    %45 = vector.shape_cast %44 : vector<1x16x8xf32> to vector<16x8xf32>
    %46 = vector.extract_strided_slice %43 {offsets = [0, 16, 0], sizes = [1, 16, 8], strides = [1, 1, 1]} : vector<2x32x8xf32> to vector<1x16x8xf32>
    %47 = vector.shape_cast %46 : vector<1x16x8xf32> to vector<16x8xf32>
    %48 = vector.extract_strided_slice %43 {offsets = [1, 0, 0], sizes = [1, 16, 8], strides = [1, 1, 1]} : vector<2x32x8xf32> to vector<1x16x8xf32>
    %49 = vector.shape_cast %48 : vector<1x16x8xf32> to vector<16x8xf32>
    %50 = vector.extract_strided_slice %43 {offsets = [1, 16, 0], sizes = [1, 16, 8], strides = [1, 1, 1]} : vector<2x32x8xf32> to vector<1x16x8xf32>
    %51 = vector.shape_cast %50 : vector<1x16x8xf32> to vector<16x8xf32>
    %52 = tpu.concatenate %45, %47, %49, %51 in 1 : vector<16x8xf32>, vector<16x8xf32>, vector<16x8xf32>, vector<16x8xf32> -> vector<16x32xf32>
    %c0_13 = arith.constant 0 : index
    %c0_14 = arith.constant 0 : index
    %53 = vector.load %arg5[%c0_13, %c0_14] : memref<32x32xf32, #tpu.memory_space<vmem>>, vector<32x32xf32>
    %cst_15 = arith.constant dense<0.000000e+00> : vector<16x32xf32>
    %54 = tpu.matmul %52, %53, %cst_15 {dimension_numbers = #tpu.dot_dimension_numbers<[1], [0], [0], [1], [0, 0, 1, 1], [], []>} : vector<16x32xf32>, vector<32x32xf32>, vector<16x32xf32> -> vector<16x32xf32>
    %c0_16 = arith.constant 0 : index
    %c0_17 = arith.constant 0 : index
    %55 = vector.load %arg6[%c0_16, %c0_17] : memref<16x32xf32, #tpu.memory_space<vmem>>, vector<16x32xf32>
    tpu.vector_store %arg6[%c0_16, %c0_17], %54 {strides = array<i32>} : memref<16x32xf32, #tpu.memory_space<vmem>>, vector<16x32xf32>,
    return
  }
}

</mosaic_0001>

<bundles_post_ra>
// kernel: tpu_custom_call.1
= control target key start
LH: loop header
LB: loop body
LE: loop exit
PB: predicated region body
PF: predicated region fallthrough
CT: control target
= control target key end

     0   :  { %11 = vsyncpa [#allocation3], 0  ;;  %s1280_s0 = inlined_call_operand.vmem [shape: f32[16,32], index: 0, kind: input, shape index: {}]   ;;  %s1281_s1 = inlined_call_operand.hbm [shape: f32[16,64], index: 1, kind: input, shape index: {}]   ;;  %s1282_s2 = inlined_call_operand.hbm [shape: f32[16,64], index: 2, kind: input, shape index: {}]   ;;  %s1283_s3 = inlined_call_operand.vmem [shape: f32[32,16], index: 3, kind: input, shape index: {}]   ;;  %s1284_s4 = inlined_call_operand.vmem [shape: f32[32,128], index: 4, kind: input, shape index: {}]   ;;  %s1285_s5 = inlined_call_operand.hbm [shape: f32[32,32], index: 5, kind: input, shape index: {}]   ;;  %s1286_s6 = inlined_call_operand.hbm [shape: f32[16,32], index: 6, kind: output, shape index: {}]  }
   0x1   :  { %12 = vsyncpa [#allocation6], 0 }
   0x2   :  { %13 = vsyncpa [#allocation4], 0  ;;  %s1084_s21 = smov [#allocation5]   ;;  %s1085_s23 = smov [#allocation2]  }
   0x3   :  { %s33_s22 = sshll.u32 %s1084_s21, 4  ;;  %s21_s24 = sshll.u32 %s1085_s23, 4  ;;  %s34_s22 = int_to_ptr.vmem [resolvable:$true] %s33_s22  ;;  %s22_s24 = int_to_ptr.vmem [resolvable:$true] %s21_s24 }
   0x4   :  { %s1006_s25 = scalar_lea.vmem %s34_s22, 256  ;;  %p1011_p1 = scmp.lt.s32.totalorder %s34_s22, %s34_s22 }
   0x5   :  { %p1007_p0 = scmp.ne.s32.totalorder %s34_s22, %s1006_s25  ;;  %p1012_p2 = scmp.lt.s32.totalorder %s1006_s25, %s1006_s25 }
   0x7   :  { %p1013_p3 = por %p1012_p2, %p1011_p1 }
   0x9   :  { %p1014_p4 = pnand %p1013_p3, %p1007_p0 }
   0xb   :  { %1017 = shalt.err (!%p1014_p4)
}
   0xc   :  { %s1086_s26 = smov 128   ;;  %s1087_s27 = smov 8  }
   0xd   :  { %39 = dma.hbm_to_vmem [thread:$0]  %s1282_s2, 256, %s34_s22, [#allocation6], %s1086_s26, %s1086_s26, %s1087_s27  }
   0xe   :  { %s1026_s30 = scalar_lea.vmem %s22_s24, 256  ;;  %p1031_p6 = scmp.lt.s32.totalorder %s22_s24, %s22_s24 }
   0xf   :  { %p1027_p5 = scmp.ne.s32.totalorder %s22_s24, %s1026_s30  ;;  %p1032_p7 = scmp.lt.s32.totalorder %s1026_s30, %s1026_s30 }
  0x11   :  { %p1033_p8 = por %p1032_p7, %p1031_p6 }
  0x13   :  { %p1034_p9 = pnand %p1033_p8, %p1027_p5 }
  0x15   :  { %1037 = shalt.err (!%p1034_p9)
}
  0x16   :  { %27 = dma.hbm_to_vmem [thread:$0]  %s1281_s1, 256, %s22_s24, [#allocation3], %s1086_s26, %s1086_s26, %s1087_s27  }
  0x17   :  { %s1088_s9 = smov [#allocation7]  }
  0x18   :  { %s49_s10 = sshll.u32 %s1088_s9, 4  ;;  %s50_s10 = int_to_ptr.vmem [resolvable:$true] %s49_s10 }
  0x19   :  { %s1046_s11 = scalar_lea.vmem %s50_s10, 512  ;;  %p1051_p11 = scmp.lt.s32.totalorder %s50_s10, %s50_s10 }
  0x1a   :  { %p1047_p10 = scmp.ne.s32.totalorder %s50_s10, %s1046_s11  ;;  %p1052_p12 = scmp.lt.s32.totalorder %s1046_s11, %s1046_s11 }
  0x1c   :  { %p1053_p13 = por %p1052_p12, %p1051_p11 }
  0x1e   :  { %p1054_p0 = pnand %p1053_p13, %p1047_p10 }
  0x20   :  { %1057 = shalt.err (!%p1054_p0)
}
  0x21   :  { %55 = dma.hbm_to_vmem [thread:$0]  %s1285_s5, 512, %s50_s10, [#allocation6], %s1086_s26, %s1086_s26, %s1087_s27  }
  0x22   :  { %1078 = dma.done.wait [#allocation3], 256  }
  0x23   :  { %1079 = vsyncadd [#allocation3], 4294967040 }
  0x24   :  { %1080 = dma.done.wait [#allocation6], 768  }
  0x25   :  { %1081 = vsyncadd [#allocation6], 4294966528  ;;  %vm71_vm0 = vcmask 261120   ;;  %v70_v0 = vld [vmem:[%s1284_s4 + $0x18] sm:$0xff]  ;;  %v69_v1 = vld [vmem:[%s1284_s4 + $0x10] sm:$0xff]  ;;  %s1089_s19 = smov 64  }
  0x26   :  { %891 = vmatprep.subr.mxu0 %v70_v0  ;;  %v65_v2 = vld [vmem:[%s1280_s0] sm:$0xff]  ;;  %v68_v3 = vld [vmem:[%s1284_s4 + $0x8] sm:$0xff]  ;;  %v158_v4 = vld [vmem:[#allocation5 + $0x8] sm:$0xff]  ;;  %vm201_vm1 = vcmask 64512   ;;  %s1092_s24 = smov 112   ;;  %vm400_vm2 = vcmask 130048  }
  0x27   :  { %892 = vmatpush3.msra.mxu0 %v70_v0  ;;  %899 = vmatprep.mubr.msk.f32.mxu0 %vm71_vm0, %v65_v2  ;;  %v67_v5 = vld [vmem:[%s1284_s4] sm:$0xff]  ;;  %v157_v6 = vld [vmem:[#allocation5] sm:$0xff]  ;;  %v66_v7 = vld [vmem:[%s1280_s0 + $0x8] sm:$0xff]  ;;  %s1090_s0 = smov 120   ;;  %s1091_s4 = smov 96   ;;  %vm723_vm3 = vcmask 195584  }
  0x28   :  { %893 = vmatprep.subr.mxu0 %v69_v1  ;;  %163 = vrot.lane.b32.xlu0 %v158_v4, %s1089_s19  ;;  %v154_v14 = vld [vmem:[#allocation2 + $0x8] sm:$0xff]  ;;  %v153_v16 = vld [vmem:[#allocation2] sm:$0xff]  ;;  %v195_v40 = vld [vmem:[%s1283_s3 + $0x10] sm:$0xff]  ;;  %s1094_s11 = smov 16   ;;  %s1095_s2 = smov 24  }
  0x29   :  { %894 = vmatpush3.msra.mxu0 %v69_v1  ;;  %v194_v32 = vld [vmem:[%s1283_s3 + $0x8] sm:$0xff]  ;;  %v193_v34 = vld [vmem:[%s1283_s3] sm:$0xff]  ;;  %v196_v50 = vld [vmem:[%s1283_s3 + $0x18] sm:$0xff]  ;;  %s1093_s3 = smov 80   ;;  %s1096_s12 = smov [#allocation8]  }
  0x2a   :  { %895 = vmatprep.subr.mxu0 %v68_v3  ;;  %s818_s1 = sshll.u32 %s1096_s12, 4  ;;  %s819_s1 = int_to_ptr.vmem [resolvable:$true] %s818_s1 }
  0x2b   :  { %896 = vmatpush3.msra.mxu0 %v68_v3  ;;  %s1058_s13 = scalar_lea.vmem %s819_s1, 256  ;;  %p1063_p2 = scmp.lt.s32.totalorder %s819_s1, %s819_s1 }
  0x2c   :  { %897 = vmatprep.subr.mxu0 %v67_v5  ;;  %161 = vrot.lane.b32.xlu0 %v157_v6, %s1089_s19  ;;  %p1059_p1 = scmp.ne.s32.totalorder %s819_s1, %s1058_s13  ;;  %p1064_p3 = scmp.lt.s32.totalorder %s1058_s13, %s1058_s13 }
  0x2d   :  { %898 = vmatpush3.msra.mxu0 %v67_v5 }
  0x2e   :  { %900 = vmatmul.mubr.msk.f32.vlgmr.msra.gmra.mxu0 %vm71_vm0, %v66_v7  ;;  %p1065_p4 = por %p1064_p3, %p1063_p2 }
  0x30   :  { %p1066_p5 = pnand %p1065_p4, %p1059_p1 }
  0x9a   :  { %v164_v8 = vpop.permute.xlu0 %163 }
  0x9e   :  { %v162_v11 = vpop.permute.xlu0 %161 }
  0xee   :  { %v901_v9 = vpop.f32.mrf.mxu0 }
  0xef   :  { %v168_v10 = vmul.f32 %v901_v9, %v164_v8  ;;  %v156_v15 = vmul.f32 %v901_v9, %v154_v14 }
  0xf0   :  { %v144_v12 = vpop.f32.mrf.mxu0 }
  0xf1   :  { %173 = vrot.lane.b32.xlu1 %v168_v10, %s1089_s19  ;;  %v167_v13 = vmul.f32 %v162_v11, %v144_v12  ;;  %v155_v19 = vmul.f32 %v153_v16, %v144_v12 }
  0xf5   :  { %171 = vrot.lane.b32.xlu1 %v167_v13, %s1089_s19 }
 0x163   :  { %v174_v17 = vpop.permute.xlu1 %173 }
 0x164   :  { %v1170_v18 = vadd.f32 %v174_v17, %v156_v15 }
 0x166   :  { %183 = vrot.lane.b32.xlu0 %v1170_v18, %s1090_s0 }
 0x167   :  { %v172_v20 = vpop.permute.xlu1 %171 }
 0x168   :  { %v1173_v21 = vadd.f32 %v172_v20, %v155_v19 }
 0x16a   :  { %199 = vrot.lane.b32.xlu0 %v1170_v18, %s1091_s4  ;;  %181 = vrot.lane.b32.xlu1 %v1173_v21, %s1090_s0 }
 0x16b   :  { %906 = vmatprep.mubr.msk.f32.mxu1 %vm201_vm1, %v1173_v21 }
 0x16e   :  { %197 = vrot.lane.b32.xlu0 %v1173_v21, %s1091_s4 }
 0x172   :  { %185 = vrot.lane.b32.xlu0 %v1173_v21, %s1092_s24 }
 0x1d8   :  { %v1181_v22 = vpop.permute.xlu0 %183 }
 0x1d9   :  { %301 = vrot.lane.b32.xlu1 %v1181_v22, %s1091_s4 }
 0x1dc   :  { %v200_v23 = vpop.permute.xlu0 %199  ;;  %v1184_v24 = vpop.permute.xlu1 %181 }
 0x1dd   :  { %902 = vmatprep.subr.msk.mxu1 %vm201_vm1, %v200_v23  ;;  %189 = vrot.lane.b32.xlu0 %v1184_v24, %s1092_s24 }
 0x1de   :  { %299 = vrot.lane.b32.xlu1 %v1184_v24, %s1091_s4  ;;  %903 = vmatpush3.xpose.msk.msra.mxu1 %vm201_vm1, %v200_v23 }
 0x1e0   :  { %v198_v25 = vpop.permute.xlu0 %197 }
 0x1e1   :  { %904 = vmatprep.subr.msk.mxu1 %vm201_vm1, %v198_v25 }
 0x1e2   :  { %187 = vrot.lane.b32.xlu1 %v1170_v18, %s1092_s24  ;;  %905 = vmatpush3.xpose.msk.msra.mxu1 %vm201_vm1, %v198_v25 }
 0x1e4   :  { %v186_v26 = vpop.permute.xlu0 %185 }
 0x1e5   :  { %916 = vmatprep.mubr.msk.f32.mxu0 %vm201_vm1, %v186_v26  ;;  %907 = vmatmul.mubr.msk.f32.vlgmr.msra.gmra.mxu1 %vm201_vm1, %v1170_v18 }
 0x1e6   :  { %191 = vrot.lane.b32.xlu1 %v1181_v22, %s1092_s24  ;;  %909 = vmatprep.mubr.msk.f32.mxu1 %vm201_vm1, %v1184_v24 }
 0x1e9   :  { %910 = vmatmul.mubr.msk.f32.gmra.mxu1 %vm201_vm1, %v1181_v22 }
 0x24b   :  { %v302_v27 = vpop.permute.xlu1 %301 }
 0x24c   :  { %912 = vmatprep.subr.msk.mxu0 %vm201_vm1, %v302_v27 }
 0x24d   :  { %913 = vmatpush3.xpose.msk.msra.mxu0 %vm201_vm1, %v302_v27 }
 0x24f   :  { %v190_v30 = vpop.permute.xlu0 %189 }
 0x250   :  { %v300_v28 = vpop.permute.xlu1 %299 }
 0x251   :  { %914 = vmatprep.subr.msk.mxu0 %vm201_vm1, %v300_v28 }
 0x252   :  { %915 = vmatpush3.xpose.msk.msra.mxu0 %vm201_vm1, %v300_v28 }
 0x254   :  { %v188_v29 = vpop.permute.xlu1 %187 }
 0x255   :  { %917 = vmatmul.mubr.msk.f32.vlgmr.msra.gmra.mxu0 %vm201_vm1, %v188_v29 }
 0x256   :  { %919 = vmatprep.mubr.msk.f32.mxu0 %vm201_vm1, %v190_v30 }
 0x258   :  { %v192_v31 = vpop.permute.xlu1 %191 }
 0x259   :  { %920 = vmatmul.mubr.msk.f32.gmra.mxu0 %vm201_vm1, %v192_v31 }
 0x2a5   :  { %v908_v33 = vpop.f32.mrf.mxu1 }
 0x2a6   :  { %v286_v35 = vadd.f32 %v908_v33, %v194_v32 }
 0x2a7   :  { %v280_v36 = vpop.f32.mrf.mxu1 }
 0x2a8   :  { %v281_v37 = vadd.f32 %v280_v36, %v193_v34  ;;  %v404_v38 = vsel %vm400_vm2, %v286_v35, -inf }
 0x2a9   :  { %405 = vmax.xlane.f32.xlu1 %v404_v38  ;;  %v911_v39 = vpop.f32.mrf.mxu1 }
 0x2aa   :  { %v401_v41 = vsel %vm400_vm2, %v281_v37, -inf  ;;  %v296_v53 = vadd.f32 %v911_v39, %v196_v50 }
 0x2ab   :  { %v290_v42 = vpop.f32.mrf.mxu1  ;;  %402 = vmax.xlane.f32.xlu0 %v401_v41 }
 0x2ac   :  { %v291_v43 = vadd.f32 %v290_v42, %v195_v40  ;;  %v410_v58 = vsel %vm400_vm2, %v296_v53, -inf }
 0x2ae   :  { %v407_v44 = vsel %vm400_vm2, %v291_v43, -inf }
 0x2af   :  { %408 = vmax.xlane.f32.xlu1 %v407_v44 }
 0x315   :  { %v918_v45 = vpop.f32.mrf.mxu0 }
 0x316   :  { %v387_v46 = vadd.f32 %v918_v45, %v194_v32 }
 0x317   :  { %v381_v47 = vpop.f32.mrf.mxu0 }
 0x318   :  { %v382_v48 = vadd.f32 %v381_v47, %v193_v34  ;;  %v416_v49 = vsel %vm400_vm2, %v387_v46, -inf }
 0x319   :  { %v921_v51 = vpop.f32.mrf.mxu0  ;;  %417 = vmax.xlane.f32.xlu0 %v416_v49 }
 0x31a   :  { %v413_v55 = vsel %vm400_vm2, %v382_v48, -inf  ;;  %v397_v57 = vadd.f32 %v921_v51, %v196_v50 }
 0x31b   :  { %v391_v52 = vpop.f32.mrf.mxu0 }
 0x31c   :  { %v1224_v54 = vadd.f32 %v391_v52, %v195_v40  ;;  %v422_v59 = vsel %vm400_vm2, %v397_v57, -inf }
 0x31d   :  { %414 = vmax.xlane.f32.xlu0 %v413_v55 }
 0x31e   :  { %v419_v56 = vsel %vm400_vm2, %v1224_v54, -inf }
 0x31f   :  { %420 = vmax.xlane.f32.xlu1 %v419_v56 }
 0x321   :  { %411 = vmax.xlane.f32.xlu0 %v410_v58 }
 0x325   :  { %423 = vmax.xlane.f32.xlu0 %v422_v59 }
 0x330   :  { %491 = vrot.lane.b32.xlu1 %v1170_v18, %s1093_s3 }
 0x332   :  { %v406_v60 = vpop.xlane.xlu1 %405 }
 0x333   :  { %v426_v61 = vsub.f32 %v286_v35, %v406_v60 }
 0x334   :  { %v403_v63 = vpop.xlane.xlu0 %402 }
 0x335   :  { %v435_v62 = vmul.f32 1.442695, %v426_v61  ;;  %v425_v0 = vsub.f32 %v281_v37, %v403_v63 }
 0x337   :  { %966 = vpow2.f32 %v435_v62  ;;  %v433_v2 = vmul.f32 1.442695, %v425_v0 }
 0x338   :  { %v409_v1 = vpop.xlane.xlu1 %408 }
 0x339   :  { %v427_v3 = vsub.f32 %v291_v43, %v409_v1  ;;  %968 = vpow2.f32 %v433_v2 }
 0x33b   :  { %v437_v4 = vmul.f32 1.442695, %v427_v3 }
 0x33d   :  { %970 = vpow2.f32 %v437_v4  ;;  %v729_v4 = vld [vmem:[#allocation7 + $0x18] sm:$0xff] }
 0x344   :  { %v1233_v5 = vpop.eup %966 }
 0x345   :  { %v452_v6 = vsel %vm400_vm2, %v1233_v5, 0.0 }
 0x346   :  { %453 = vadd.xlane.f32.xlu0 %v452_v6  ;;  %v969_v7 = vpop.eup %968  ;;  %v727_v6 = vld [vmem:[#allocation7 + $0x8] sm:$0xff] }
 0x347   :  { %v449_v8 = vsel %vm400_vm2, %v969_v7, 0.0 }
 0x34a   :  { %v1238_v9 = vpop.eup %970 }
 0x34b   :  { %v455_v10 = vsel %vm400_vm2, %v1238_v9, 0.0 }
 0x354   :  { %450 = vadd.xlane.f32.xlu1 %v449_v8 }
 0x358   :  { %456 = vadd.xlane.f32.xlu1 %v455_v10 }
 0x3a2   :  { %v418_v11 = vpop.xlane.xlu0 %417 }
 0x3a3   :  { %v430_v15 = vsub.f32 %v387_v46, %v418_v11 }
 0x3a5   :  { %v443_v20 = vmul.f32 1.442695, %v430_v15 }
 0x3a6   :  { %v415_v12 = vpop.xlane.xlu0 %414 }
 0x3a7   :  { %v429_v13 = vsub.f32 %v382_v48, %v415_v12 }
 0x3a8   :  { %v421_v14 = vpop.xlane.xlu1 %420 }
 0x3a9   :  { %v441_v16 = vmul.f32 1.442695, %v429_v13  ;;  %v431_v36 = vsub.f32 %v1224_v54, %v421_v14 }
 0x3aa   :  { %v412_v17 = vpop.xlane.xlu0 %411 }
 0x3ab   :  { %972 = vpow2.f32 %v441_v16  ;;  %v428_v18 = vsub.f32 %v296_v53, %v412_v17  ;;  %v445_v37 = vmul.f32 1.442695, %v431_v36 }
 0x3ac   :  { %v492_v19 = vpop.permute.xlu1 %491 }
 0x3ad   :  { %v439_v23 = vmul.f32 1.442695, %v428_v18  ;;  %922 = vmatprep.subr.mxu1 %v492_v19 }
 0x3ae   :  { %923 = vmatpush3.msra.mxu1 %v492_v19  ;;  %v424_v25 = vpop.xlane.xlu0 %423 }
 0x3af   :  { %974 = vpow2.f32 %v439_v23  ;;  %v432_v26 = vsub.f32 %v397_v57, %v424_v25 }
 0x3b0   :  { %976 = vpow2.f32 %v443_v20 }
 0x3b1   :  { %v447_v27 = vmul.f32 1.442695, %v432_v26 }
 0x3b3   :  { %978 = vpow2.f32 %v447_v27 }
 0x3b4   :  { %980 = vpow2.f32 %v445_v37 }
 0x3b8   :  { %v973_v28 = vpop.eup %972 }
 0x3b9   :  { %v461_v29 = vsel %vm400_vm2, %v973_v28, 0.0 }
 0x3ba   :  { %462 = vadd.xlane.f32.xlu1 %v461_v29 }
 0x3bc   :  { %v975_v30 = vpop.eup %974 }
 0x3bd   :  { %v458_v31 = vsel %vm400_vm2, %v975_v30, 0.0  ;;  %v977_v32 = vpop.eup %976 }
 0x3be   :  { %459 = vadd.xlane.f32.xlu0 %v458_v31  ;;  %v464_v33 = vsel %vm400_vm2, %v977_v32, 0.0 }
 0x3c0   :  { %v979_v34 = vpop.eup %978 }
 0x3c1   :  { %v470_v35 = vsel %vm400_vm2, %v979_v34, 0.0  ;;  %v981_v39 = vpop.eup %980 }
 0x3c2   :  { %465 = vadd.xlane.f32.xlu0 %v464_v33  ;;  %v467_v42 = vsel %vm400_vm2, %v981_v39, 0.0 }
 0x3c6   :  { %471 = vadd.xlane.f32.xlu0 %v470_v35 }
 0x3cb   :  { %594 = vrot.lane.b32.xlu1 %v1181_v22, %s1093_s3 }
 0x3cf   :  { %v454_v43 = vpop.xlane.xlu0 %453 }
 0x3dc   :  { %489 = vrot.lane.b32.xlu0 %v1173_v21, %s1093_s3 }
 0x3dd   :  { %v451_v38 = vpop.xlane.xlu1 %450 }
 0x3de   :  { %982 = vrcp.f32 %v451_v38 }
 0x3df   :  { %984 = vrcp.f32 %v454_v43 }
 0x3e1   :  { %v457_v22 = vpop.xlane.xlu1 %456 }
 0x3eb   :  { %v983_v40 = vpop.eup %982 }
 0x3ec   :  { %v474_v41 = vmul.f32 %v983_v40, %v969_v7  ;;  %v985_v48 = vpop.eup %984  ;;  %v726_v7 = vld [vmem:[#allocation7] sm:$0xff] }
 0x3ee   :  { %926 = vmatprep.mubr.msk.f32.mxu1 %vm400_vm2, %v474_v41 }
 0x3ef   :  { %468 = vadd.xlane.f32.xlu1 %v467_v42 }
 0x400   :  { %592 = vrot.lane.b32.xlu1 %v1184_v24, %s1093_s3  ;;  %v476_v24 = vmul.f32 %v985_v48, %v1233_v5  ;;  %v728_v5 = vld [vmem:[#allocation7 + $0x10] sm:$0xff] }
 0x443   :  { %v463_v44 = vpop.xlane.xlu1 %462 }
 0x444   :  { %986 = vrcp.f32 %v463_v44 }
 0x445   :  { %988 = vrcp.f32 %v457_v22 }
 0x447   :  { %v595_v21 = vpop.permute.xlu1 %594  ;;  %v460_v45 = vpop.xlane.xlu0 %459 }
 0x448   :  { %990 = vrcp.f32 %v460_v45  ;;  %932 = vmatprep.subr.mxu0 %v595_v21 }
 0x449   :  { %933 = vmatpush3.msra.mxu0 %v595_v21 }
 0x44b   :  { %v466_v46 = vpop.xlane.xlu0 %465 }
 0x44c   :  { %992 = vrcp.f32 %v466_v46 }
 0x44f   :  { %v472_v47 = vpop.xlane.xlu0 %471 }
 0x450   :  { %994 = vrcp.f32 %v472_v47 }
 0x451   :  { %v987_v49 = vpop.eup %986 }
 0x452   :  { %v989_v50 = vpop.eup %988  ;;  %v482_v51 = vmul.f32 %v987_v49, %v973_v28 }
 0x453   :  { %v490_v52 = vpop.permute.xlu0 %489  ;;  %v478_v54 = vmul.f32 %v989_v50, %v1238_v9 }
 0x454   :  { %924 = vmatprep.subr.mxu1 %v490_v52  ;;  %936 = vmatprep.mubr.msk.f32.mxu0 %vm400_vm2, %v482_v51 }
 0x455   :  { %v991_v53 = vpop.eup %990  ;;  %925 = vmatpush3.msra.mxu1 %v490_v52 }
 0x456   :  { %927 = vmatmul.mubr.msk.f32.vlgmr.msra.gmra.mxu1 %vm400_vm2, %v476_v24  ;;  %v480_v55 = vmul.f32 %v991_v53, %v975_v30  ;;  %942 = vmatprep.subr.mxu1 %v729_v4 }
 0x457   :  { %929 = vmatprep.mubr.msk.f32.mxu1 %vm400_vm2, %v478_v54  ;;  %943 = vmatpush3.msra.mxu1 %v729_v4 }
 0x458   :  { %944 = vmatprep.subr.mxu1 %v728_v5 }
 0x459   :  { %v993_v57 = vpop.eup %992  ;;  %945 = vmatpush3.msra.mxu1 %v728_v5 }
 0x45a   :  { %930 = vmatmul.mubr.msk.f32.gmra.mxu1 %vm400_vm2, %v480_v55  ;;  %v484_v59 = vmul.f32 %v993_v57, %v977_v32  ;;  %946 = vmatprep.subr.mxu1 %v727_v6 }
 0x45b   :  { %947 = vmatpush3.msra.mxu1 %v727_v6 }
 0x45c   :  { %948 = vmatprep.subr.mxu1 %v726_v7 }
 0x45d   :  { %v995_v60 = vpop.eup %994  ;;  %949 = vmatpush3.msra.mxu1 %v726_v7 }
 0x45e   :  { %v488_v63 = vmul.f32 %v995_v60, %v979_v34 }
 0x478   :  { %v469_v56 = vpop.xlane.xlu1 %468 }
 0x479   :  { %996 = vrcp.f32 %v469_v56 }
 0x47c   :  { %v593_v58 = vpop.permute.xlu1 %592 }
 0x47d   :  { %934 = vmatprep.subr.mxu0 %v593_v58 }
 0x47e   :  { %935 = vmatpush3.msra.mxu0 %v593_v58 }
 0x47f   :  { %937 = vmatmul.mubr.msk.f32.vlgmr.msra.gmra.mxu0 %vm400_vm2, %v484_v59 }
 0x486   :  { %v997_v61 = vpop.eup %996 }
 0x487   :  { %v486_v62 = vmul.f32 %v997_v61, %v981_v39 }
 0x489   :  { %939 = vmatprep.mubr.msk.f32.mxu0 %vm400_vm2, %v486_v62 }
 0x48a   :  { %940 = vmatmul.mubr.msk.f32.gmra.mxu0 %vm400_vm2, %v488_v63 }
 0x516   :  { %v928_v0 = vpop.f32.mrf.mxu1 }
 0x518   :  { %v573_v1 = vpop.f32.mrf.mxu1 }
 0x51a   :  { %v931_v2 = vpop.f32.mrf.mxu1 }
 0x51b   :  { %699 = vrot.lane.b32.xlu1 %v931_v2, %s1087_s27 }
 0x51c   :  { %v583_v3 = vpop.f32.mrf.mxu1 }
 0x51d   :  { %697 = vrot.lane.b32.xlu0 %v583_v3, %s1087_s27 }
 0x53f   :  { %v938_v8 = vpop.f32.mrf.mxu0 }
 0x540   :  { %707 = vrot.lane.b32.xlu1 %v938_v8, %s1094_s11 }
 0x541   :  { %v676_v9 = vpop.f32.mrf.mxu0 }
 0x542   :  { %705 = vrot.lane.b32.xlu0 %v676_v9, %s1094_s11 }
 0x54a   :  { %v941_v10 = vpop.f32.mrf.mxu0 }
 0x54b   :  { %715 = vrot.lane.b32.xlu1 %v941_v10, %s1095_s2 }
 0x54c   :  { %v686_v11 = vpop.f32.mrf.mxu0 }
 0x54d   :  { %713 = vrot.lane.b32.xlu0 %v686_v11, %s1095_s2 }
 0x58d   :  { %v700_v12 = vpop.permute.xlu1 %699 }
 0x58e   :  { %v720_v18 = vsel %vm201_vm1, %v928_v0, %v700_v12 }
 0x58f   :  { %v698_v13 = vpop.permute.xlu0 %697 }
 0x590   :  { %v719_v16 = vsel %vm201_vm1, %v573_v1, %v698_v13 }
 0x5b2   :  { %v708_v14 = vpop.permute.xlu1 %707 }
 0x5b3   :  { %v722_v23 = vsel %vm400_vm2, %v720_v18, %v708_v14 }
 0x5b4   :  { %v706_v15 = vpop.permute.xlu0 %705 }
 0x5b5   :  { %v721_v19 = vsel %vm400_vm2, %v719_v16, %v706_v15 }
 0x5bd   :  { %v716_v17 = vpop.permute.xlu1 %715 }
 0x5be   :  { %v725_v26 = vsel %vm723_vm3, %v722_v23, %v716_v17 }
 0x5bf   :  { %v714_v20 = vpop.permute.xlu0 %713 }
 0x5c0   :  { %v724_v25 = vsel %vm723_vm3, %v721_v19, %v714_v20 }
 0x5c1   :  { %950 = vmatprep.mubr.msk.f32.mxu1 %vm71_vm0, %v724_v25 }
 0x5c2   :  { %951 = vmatmul.mubr.msk.f32.vlgmr.msra.gmra.mxu1 %vm71_vm0, %v725_v26 }
 0x682   :  { %v952_v27 = vpop.f32.mrf.mxu1 }
 0x683   :  { %812 = vst.msk [vmem:[#allocation8 + $0x8] sm:$0xff] %vm71_vm0, %v952_v27 }
 0x684   :  { %v802_v28 = vpop.f32.mrf.mxu1 }
 0x685   :  { %811 = vst.msk [vmem:[#allocation8] sm:$0xff] %vm71_vm0, %v802_v28 }
 0x686   :  { %1069 = shalt.err (!%p1066_p5)
}
 0x687   :  { %824 = dma.vmem_to_hbm [thread:$0]  %s819_s1, 256, %s1286_s6, [#allocation4], %s1086_s26, %s1086_s26, %s1087_s27  }
 0x688   :  { %1082 = dma.done.wait [#allocation4], 256  }
 0x689   :  { %1083 = vsyncadd [#allocation4], 4294967040 }
 0x68a   :  { %828 = vsyncpa [#allocation3], 1 }
 0x68b   :  { %829 = vsyncpa [#allocation6], 1 }
 0x68c   :  { %830 = vsyncpa [#allocation4], 1 }

</bundles_post_ra>
